<compile_context>
chip_gen: v7x
topology: tpu7x:2x2x1
jax: 0.10.0
libtpu: 0.0.40
codegen_flags: <defaults>
</compile_context>

<pallas_src>
import numpy as np
import jax
import jax.numpy as jnp
from jax.experimental import pallas as pl
from jax.experimental.pallas import tpu as pltpu

try:
    from scipy.optimize import linear_sum_assignment as _linear_sum_assignment
except Exception:  # scipy may not be present in the sandbox
    _linear_sum_assignment = None


def _round_up(x: int, m: int) -> int:
    return ((x + m - 1) // m) * m


# ------------------------------- Pallas kernel -------------------------------

def _make_cost_kernel(cost_class_w: float, cost_pose_w: float):
    alpha = 0.25  # focal alpha (hard-coded in the reference forward); gamma = 2 -> explicit squares

    def kernel(logit1T_ref, poseT_ref, tgtT_ref, scale_ref, offset_ref, c_ref):
        m_pad = tgtT_ref.shape[1]

        # ---- focal classification cost, lane-dense (queries on lanes) ----
        # target class is always 1 in the reference, so this is a per-query scalar row.
        p = jax.nn.sigmoid(logit1T_ref[...])                                   # [1, T]
        neg = (1.0 - alpha) * (p * p) * (-jnp.log(1.0 - p + 1e-8))
        pos = alpha * ((1.0 - p) * (1.0 - p)) * (-jnp.log(p + 1e-8))
        cost_class = pos - neg                                                 # [1, T]

        # ---- norm2absolute (offset = grid_center - grid_size/2 hoisted in wrapper) ----
        scale = scale_ref[...]                                                 # [D_pad, 1]
        offset = offset_ref[...]                                               # [D_pad, 1]
        x_abs = poseT_ref[...] * scale + offset                                # [D_pad, T]
        # GT transform is tiny ([D_pad, M_pad]); recomputed per tile (megacore-safe).
        y_abs = tgtT_ref[...] * scale + offset                                 # [D_pad, M_pad]

        # ---- L1 cdist: reduce over D along the SUBLANE axis (lane-dense throughout) ----
        rows = []
        for m in range(m_pad):                                                 # static, small, fixed
            ym = y_abs[:, m:m + 1]                                             # [D_pad, 1]
            rows.append(jnp.sum(jnp.abs(x_abs - ym), axis=0, keepdims=True))   # [1, T]
        cost_pose = 0.01 * jnp.concatenate(rows, axis=0)                       # [M_pad, T]

        # lane-dense store: [M_pad, T] with T a multiple of 128
        c_ref[...] = cost_pose_w * cost_pose + cost_class_w * cost_class

    return kernel


def compute_cost_matrix(pred_logits, pred_coords_norm, gt_3d_norm, num_person_gt,
                        grid_size, grid_center, cost_class_w=1.0, cost_pose_w=1.0):
    """Returns (C [B, Q, M_total], sizes). All hot-path math runs in the Pallas kernel,
    which emits the transposed, padded cost matrix C^T [M_pad, N_pad]."""
    bs, nq, ncls = pred_logits.shape
    _, max_p, nj, cdim = gt_3d_norm.shape
    N = bs * nq
    D = nj * cdim

    sizes = [int(v) for v in np.asarray(num_person_gt)]
    M_total = int(sum(sizes))

    # ---- static padded sizes (fixed by B / MAX_P / D -> no recompile per batch) ----
    D_pad = _round_up(D, 8)
    M_pad = max(8, _round_up(bs * max_p, 8))
    N_pad = _round_up(max(N, 1), 128)
    tile_n = 128
    for cand in (1024, 512, 256, 128):                     # biggest lane tile that divides N_pad
        if N_pad % cand == 0:
            tile_n = cand
            break
    grid = (N_pad // tile_n,)

    # ---- layout plumbing: transpose + zero-pad so queries sit on the lane axis ----
    logits = pred_logits.reshape(N, ncls).astype(jnp.float32)
    logit1T = jnp.zeros((1, N_pad), jnp.float32).at[0, :N].set(logits[:, 1])

    pose = pred_coords_norm.reshape(N, D).astype(jnp.float32)
    poseT = jnp.zeros((D_pad, N_pad), jnp.float32).at[:D, :N].set(pose.T)

    # Glue: scatter the ragged per-batch GT poses into a fixed [D_pad, M_pad] slab.
    tgtT = jnp.zeros((D_pad, M_pad), jnp.float32)
    col = 0
    for i in range(bs):
        s = sizes[i]
        if s > 0:
            gt_i = gt_3d_norm[i, :s].reshape(s, D).astype(jnp.float32)
            tgtT = tgtT.at[:D, col:col + s].set(gt_i.T)
            col += s

    gs_d = jnp.tile(grid_size.astype(jnp.float32), (nj,))                       # [D]
    off_d = jnp.tile(grid_center.astype(jnp.float32), (nj,)) - 0.5 * gs_d       # hoisted offset
    scale_col = jnp.zeros((D_pad, 1), jnp.float32).at[:D, 0].set(gs_d)
    offset_col = jnp.zeros((D_pad, 1), jnp.float32).at[:D, 0].set(off_d)

    kernel = _make_cost_kernel(float(cost_class_w), float(cost_pose_w))

    cT = pl.pallas_call(
        kernel,
        out_shape=jax.ShapeDtypeStruct((M_pad, N_pad), jnp.float32),
        grid=grid,
        in_specs=[
            pl.BlockSpec((1, tile_n), lambda i: (0, i)),          # class-1 logits (lane-tiled)
            pl.BlockSpec((D_pad, tile_n), lambda i: (0, i)),      # predicted poses (lane-tiled)
            pl.BlockSpec((D_pad, M_pad), lambda i: (0, 0)),       # GT poses (resident)
            pl.BlockSpec((D_pad, 1), lambda i: (0, 0)),           # per-coord grid_size (resident)
            pl.BlockSpec((D_pad, 1), lambda i: (0, 0)),           # hoisted offset (resident)
        ],
        out_specs=pl.BlockSpec((M_pad, tile_n), lambda i: (0, i)),
        compiler_params=pltpu.CompilerParams(
            dimension_semantics=("parallel",),
            vmem_limit_bytes=32 * 1024 * 1024,
        ),
    )(logit1T, poseT, tgtT, scale_col, offset_col)

    # Layout plumbing back to the reference orientation + drop padding.
    C = cT.T[:N, :M_total].reshape(bs, nq, M_total)
    return C, sizes


# ------------------------- host-side assignment (glue) -------------------------

def _greedy_assignment(cost):
    cost = np.array(cost, dtype=np.float64)
    nq, ng = cost.shape
    k = min(nq, ng)
    rows, cols = [], []
    for _ in range(k):
        r, c = np.unravel_index(np.argmin(cost), cost.shape)
        rows.append(int(r)); cols.append(int(c))
        cost[r, :] = np.inf
        cost[:, c] = np.inf
    order = np.argsort(rows)
    return np.array(rows, np.int64)[order], np.array(cols, np.int64)[order]


def _assign(cost):
    # TODO(synk): the Hungarian algorithm (scipy.linear_sum_assignment) is sequential /
    # combinatorial with no clean Pallas equivalent; it runs on host (greedy fallback if
    # scipy is unavailable) on the kernel-produced cost matrix.
    if _linear_sum_assignment is not None:
        r, c = _linear_sum_assignment(cost)
        return np.asarray(r, np.int64), np.asarray(c, np.int64)
    return _greedy_assignment(cost)


def hungarian_matcher_forward(pred_logits, pred_coords_norm, gt_3d_norm, num_person_gt,
                              grid_size, grid_center, cost_class_w=1.0, cost_pose_w=1.0):
    C, sizes = compute_cost_matrix(pred_logits, pred_coords_norm, gt_3d_norm, num_person_gt,
                                   grid_size, grid_center, cost_class_w, cost_pose_w)
    C_np = np.asarray(jax.block_until_ready(C))
    indices = []
    off = 0
    for b, s in enumerate(sizes):
        sub = C_np[b, :, off:off + s]
        indices.append(_assign(sub))
        off += s
    return C, indices


# --------------------------------- reference ---------------------------------

def _reference_cost(pred_logits, pred_coords_norm, gt_3d_norm, sizes, grid_size, grid_center,
                    cost_class_w, cost_pose_w):
    bs, nq, ncls = pred_logits.shape
    _, _, nj, cdim = gt_3d_norm.shape
    D = nj * cdim
    logits = np.asarray(pred_logits, np.float64).reshape(bs * nq, ncls)
    p_all = 1.0 / (1.0 + np.exp(-logits))
    alpha, gamma = 0.25, 2.0
    neg = (1 - alpha) * p_all ** gamma * -np.log(1 - p_all + 1e-8)
    pos = alpha * (1 - p_all) ** gamma * -np.log(p_all + 1e-8)
    tgt_ids = np.ones(sum(sizes), np.int64)
    cost_class = pos[:, tgt_ids] - neg[:, tgt_ids]

    gs = np.tile(np.asarray(grid_size, np.float64), nj)
    gc = np.tile(np.asarray(grid_center, np.float64), nj)
    x = np.asarray(pred_coords_norm, np.float64).reshape(bs * nq, D) * gs + gc - gs / 2.0
    tgt = np.concatenate([np.asarray(gt_3d_norm, np.float64)[i, :sizes[i]].reshape(sizes[i], D)
                          for i in range(bs)], axis=0)
    y = tgt * gs + gc - gs / 2.0
    cost_pose = 0.01 * np.abs(x[:, None, :] - y[None, :, :]).sum(-1)
    C = cost_pose_w * cost_pose + cost_class_w * cost_class
    return C.reshape(bs, nq, -1)


# ----------------------------------- main -----------------------------------

if __name__ == "__main__":
    key = jax.random.PRNGKey(0)
    bs, nq, ncls = 2, 16, 2
    nj, cdim, max_p = 15, 3, 5
    num_person_gt = np.array([3, 2], dtype=np.int32)

    k1, k2, k3 = jax.random.split(key, 3)
    pred_logits = jax.random.normal(k1, (bs, nq, ncls), dtype=jnp.float32)
    pred_coords_norm = jax.random.uniform(k2, (bs, nq, nj * cdim), dtype=jnp.float32)
    gt_3d_norm = jax.random.uniform(k3, (bs, max_p, nj, cdim), dtype=jnp.float32)

    # deterministic "grid" parameters (normally set on the module externally)
    grid_size = jnp.array([8000.0, 8000.0, 2000.0], dtype=jnp.float32)
    grid_center = jnp.array([0.0, 0.0, 800.0], dtype=jnp.float32)

    C, indices = hungarian_matcher_forward(
        pred_logits, pred_coords_norm, gt_3d_norm, num_person_gt,
        grid_size, grid_center, cost_class_w=1.0, cost_pose_w=1.0)
    C = jax.block_until_ready(C)

    # correctness check vs. pure-numpy reference of the PyTorch math
    sizes = [int(v) for v in num_person_gt]
    C_ref = _reference_cost(np.asarray(pred_logits), np.asarray(pred_coords_norm),
                            np.asarray(gt_3d_norm), sizes,
                            np.asarray(grid_size), np.asarray(grid_center), 1.0, 1.0)
    assert np.allclose(np.asarray(C), C_ref, rtol=1e-4, atol=1e-3), "cost matrix mismatch"
    for (i, j), s in zip(indices, sizes):
        assert len(i) == len(j) == min(nq, s)

    print("KERNEL_OK")
</pallas_src>

<mosaic_0001>
module attributes {stable_mosaic.version = 11 : i64} {
  func.func @kernel(%arg0: i32, %arg1: memref<1x128xf32, #tpu.memory_space<vmem>>, %arg2: memref<48x128xf32, #tpu.memory_space<vmem>>, %arg3: memref<48x16xf32, #tpu.memory_space<vmem>>, %arg4: memref<48x1xf32, #tpu.memory_space<vmem>>, %arg5: memref<48x1xf32, #tpu.memory_space<vmem>>, %arg6: memref<16x128xf32, #tpu.memory_space<vmem>>) attributes {dimension_semantics = [#tpu.dimension_semantics<parallel>], iteration_bounds = array<i64: 1>, scalar_prefetch = 0 : i64, scratch_operands = 0 : i64, tpu.core_type = #tpu.core_type<tc>, window_params = [{transform_indices = @transform_0, window_bounds = array<i64: 1, 128>}, {transform_indices = @transform_1, window_bounds = array<i64: 48, 128>}, {pipeline_mode = #tpu.pipeline_mode<synchronous>, transform_indices = @transform_2, window_bounds = array<i64: 48, 16>}, {pipeline_mode = #tpu.pipeline_mode<synchronous>, transform_indices = @transform_3, window_bounds = array<i64: 48, 1>}, {pipeline_mode = #tpu.pipeline_mode<synchronous>, transform_indices = @transform_4, window_bounds = array<i64: 48, 1>}, {transform_indices = @transform_5, window_bounds = array<i64: 16, 128>}]} {
    %c0 = arith.constant 0 : index
    %c0_0 = arith.constant 0 : index
    %0 = vector.load %arg1[%c0, %c0_0] : memref<1x128xf32, #tpu.memory_space<vmem>>, vector<1x128xf32>
    %1 = arith.negf %0 : vector<1x128xf32>
    %2 = math.exp %1 : vector<1x128xf32>
    %cst = arith.constant 1.000000e+00 : f32
    %3 = vector.broadcast %cst : f32 to vector<1x128xf32>
    %4 = arith.addf %3, %2 : vector<1x128xf32>
    %5 = arith.divf %3, %4 : vector<1x128xf32>
    %6 = arith.mulf %5, %5 : vector<1x128xf32>
    %cst_1 = arith.constant 7.500000e-01 : f32
    %7 = vector.broadcast %cst_1 : f32 to vector<1x128xf32>
    %8 = arith.mulf %7, %6 : vector<1x128xf32>
    %cst_2 = arith.constant 1.000000e+00 : f32
    %9 = vector.broadcast %cst_2 : f32 to vector<1x128xf32>
    %10 = arith.subf %9, %5 : vector<1x128xf32>
    %cst_3 = arith.constant 9.99999993E-9 : f32
    %11 = vector.broadcast %cst_3 : f32 to vector<1x128xf32>
    %12 = arith.addf %10, %11 : vector<1x128xf32>
    %13 = math.log %12 : vector<1x128xf32>
    %cst_4 = arith.constant 0.000000e+00 : f32
    %14 = vector.broadcast %cst_4 : f32 to vector<1x128xf32>
    %15 = arith.subf %14, %13 : vector<1x128xf32>
    %16 = arith.mulf %8, %15 : vector<1x128xf32>
    %cst_5 = arith.constant 1.000000e+00 : f32
    %17 = vector.broadcast %cst_5 : f32 to vector<1x128xf32>
    %18 = arith.subf %17, %5 : vector<1x128xf32>
    %cst_6 = arith.constant 1.000000e+00 : f32
    %19 = vector.broadcast %cst_6 : f32 to vector<1x128xf32>
    %20 = arith.subf %19, %5 : vector<1x128xf32>
    %21 = arith.mulf %18, %20 : vector<1x128xf32>
    %cst_7 = arith.constant 2.500000e-01 : f32
    %22 = vector.broadcast %cst_7 : f32 to vector<1x128xf32>
    %23 = arith.mulf %22, %21 : vector<1x128xf32>
    %cst_8 = arith.constant 9.99999993E-9 : f32
    %24 = vector.broadcast %cst_8 : f32 to vector<1x128xf32>
    %25 = arith.addf %5, %24 : vector<1x128xf32>
    %26 = math.log %25 : vector<1x128xf32>
    %cst_9 = arith.constant 0.000000e+00 : f32
    %27 = vector.broadcast %cst_9 : f32 to vector<1x128xf32>
    %28 = arith.subf %27, %26 : vector<1x128xf32>
    %29 = arith.mulf %23, %28 : vector<1x128xf32>
    %30 = arith.subf %29, %16 : vector<1x128xf32>
    %c0_10 = arith.constant 0 : index
    %c0_11 = arith.constant 0 : index
    %31 = vector.load %arg4[%c0_10, %c0_11] : memref<48x1xf32, #tpu.memory_space<vmem>>, vector<48x1xf32>
    %c0_12 = arith.constant 0 : index
    %c0_13 = arith.constant 0 : index
    %32 = vector.load %arg5[%c0_12, %c0_13] : memref<48x1xf32, #tpu.memory_space<vmem>>, vector<48x1xf32>
    %c0_14 = arith.constant 0 : index
    %c0_15 = arith.constant 0 : index
    %33 = vector.load %arg2[%c0_14, %c0_15] : memref<48x128xf32, #tpu.memory_space<vmem>>, vector<48x128xf32>
    %34 = vector.broadcast %31 : vector<48x1xf32> to vector<48x128xf32>
    %35 = arith.mulf %33, %34 : vector<48x128xf32>
    %36 = vector.broadcast %32 : vector<48x1xf32> to vector<48x128xf32>
    %37 = arith.addf %35, %36 : vector<48x128xf32>
    %c0_16 = arith.constant 0 : index
    %c0_17 = arith.constant 0 : index
    %38 = vector.load %arg3[%c0_16, %c0_17] : memref<48x16xf32, #tpu.memory_space<vmem>>, vector<48x16xf32>
    %39 = vector.broadcast %31 : vector<48x1xf32> to vector<48x16xf32>
    %40 = arith.mulf %38, %39 : vector<48x16xf32>
    %41 = vector.broadcast %32 : vector<48x1xf32> to vector<48x16xf32>
    %42 = arith.addf %40, %41 : vector<48x16xf32>
    %43 = vector.extract_strided_slice %42 {offsets = [0, 0], sizes = [48, 1], strides = [1, 1]} : vector<48x16xf32> to vector<48x1xf32>
    %44 = vector.broadcast %43 : vector<48x1xf32> to vector<48x128xf32>
    %45 = arith.subf %37, %44 : vector<48x128xf32>
    %46 = math.absf %45 : vector<48x128xf32>
    %cst_18 = arith.constant dense<0.000000e+00> : vector<128xf32>
    %47 = vector.multi_reduction <add>, %46, %cst_18 [0] : vector<48x128xf32> to vector<128xf32>
    %48 = vector.shape_cast %47 : vector<128xf32> to vector<1x128xf32>
    %49 = vector.extract_strided_slice %42 {offsets = [0, 1], sizes = [48, 1], strides = [1, 1]} : vector<48x16xf32> to vector<48x1xf32>
    %50 = vector.broadcast %49 : vector<48x1xf32> to vector<48x128xf32>
    %51 = arith.subf %37, %50 : vector<48x128xf32>
    %52 = math.absf %51 : vector<48x128xf32>
    %cst_19 = arith.constant dense<0.000000e+00> : vector<128xf32>
    %53 = vector.multi_reduction <add>, %52, %cst_19 [0] : vector<48x128xf32> to vector<128xf32>
    %54 = vector.shape_cast %53 : vector<128xf32> to vector<1x128xf32>
    %55 = vector.extract_strided_slice %42 {offsets = [0, 2], sizes = [48, 1], strides = [1, 1]} : vector<48x16xf32> to vector<48x1xf32>
    %56 = vector.broadcast %55 : vector<48x1xf32> to vector<48x128xf32>
    %57 = arith.subf %37, %56 : vector<48x128xf32>
    %58 = math.absf %57 : vector<48x128xf32>
    %cst_20 = arith.constant dense<0.000000e+00> : vector<128xf32>
    %59 = vector.multi_reduction <add>, %58, %cst_20 [0] : vector<48x128xf32> to vector<128xf32>
    %60 = vector.shape_cast %59 : vector<128xf32> to vector<1x128xf32>
    %61 = vector.extract_strided_slice %42 {offsets = [0, 3], sizes = [48, 1], strides = [1, 1]} : vector<48x16xf32> to vector<48x1xf32>
    %62 = vector.broadcast %61 : vector<48x1xf32> to vector<48x128xf32>
    %63 = arith.subf %37, %62 : vector<48x128xf32>
    %64 = math.absf %63 : vector<48x128xf32>
    %cst_21 = arith.constant dense<0.000000e+00> : vector<128xf32>
    %65 = vector.multi_reduction <add>, %64, %cst_21 [0] : vector<48x128xf32> to vector<128xf32>
    %66 = vector.shape_cast %65 : vector<128xf32> to vector<1x128xf32>
    %67 = vector.extract_strided_slice %42 {offsets = [0, 4], sizes = [48, 1], strides = [1, 1]} : vector<48x16xf32> to vector<48x1xf32>
    %68 = vector.broadcast %67 : vector<48x1xf32> to vector<48x128xf32>
    %69 = arith.subf %37, %68 : vector<48x128xf32>
    %70 = math.absf %69 : vector<48x128xf32>
    %cst_22 = arith.constant dense<0.000000e+00> : vector<128xf32>
    %71 = vector.multi_reduction <add>, %70, %cst_22 [0] : vector<48x128xf32> to vector<128xf32>
    %72 = vector.shape_cast %71 : vector<128xf32> to vector<1x128xf32>
    %73 = vector.extract_strided_slice %42 {offsets = [0, 5], sizes = [48, 1], strides = [1, 1]} : vector<48x16xf32> to vector<48x1xf32>
    %74 = vector.broadcast %73 : vector<48x1xf32> to vector<48x128xf32>
    %75 = arith.subf %37, %74 : vector<48x128xf32>
    %76 = math.absf %75 : vector<48x128xf32>
    %cst_23 = arith.constant dense<0.000000e+00> : vector<128xf32>
    %77 = vector.multi_reduction <add>, %76, %cst_23 [0] : vector<48x128xf32> to vector<128xf32>
    %78 = vector.shape_cast %77 : vector<128xf32> to vector<1x128xf32>
    %79 = vector.extract_strided_slice %42 {offsets = [0, 6], sizes = [48, 1], strides = [1, 1]} : vector<48x16xf32> to vector<48x1xf32>
    %80 = vector.broadcast %79 : vector<48x1xf32> to vector<48x128xf32>
    %81 = arith.subf %37, %80 : vector<48x128xf32>
    %82 = math.absf %81 : vector<48x128xf32>
    %cst_24 = arith.constant dense<0.000000e+00> : vector<128xf32>
    %83 = vector.multi_reduction <add>, %82, %cst_24 [0] : vector<48x128xf32> to vector<128xf32>
    %84 = vector.shape_cast %83 : vector<128xf32> to vector<1x128xf32>
    %85 = vector.extract_strided_slice %42 {offsets = [0, 7], sizes = [48, 1], strides = [1, 1]} : vector<48x16xf32> to vector<48x1xf32>
    %86 = vector.broadcast %85 : vector<48x1xf32> to vector<48x128xf32>
    %87 = arith.subf %37, %86 : vector<48x128xf32>
    %88 = math.absf %87 : vector<48x128xf32>
    %cst_25 = arith.constant dense<0.000000e+00> : vector<128xf32>
    %89 = vector.multi_reduction <add>, %88, %cst_25 [0] : vector<48x128xf32> to vector<128xf32>
    %90 = vector.shape_cast %89 : vector<128xf32> to vector<1x128xf32>
    %91 = vector.extract_strided_slice %42 {offsets = [0, 8], sizes = [48, 1], strides = [1, 1]} : vector<48x16xf32> to vector<48x1xf32>
    %92 = vector.broadcast %91 : vector<48x1xf32> to vector<48x128xf32>
    %93 = arith.subf %37, %92 : vector<48x128xf32>
    %94 = math.absf %93 : vector<48x128xf32>
    %cst_26 = arith.constant dense<0.000000e+00> : vector<128xf32>
    %95 = vector.multi_reduction <add>, %94, %cst_26 [0] : vector<48x128xf32> to vector<128xf32>
    %96 = vector.shape_cast %95 : vector<128xf32> to vector<1x128xf32>
    %97 = vector.extract_strided_slice %42 {offsets = [0, 9], sizes = [48, 1], strides = [1, 1]} : vector<48x16xf32> to vector<48x1xf32>
    %98 = vector.broadcast %97 : vector<48x1xf32> to vector<48x128xf32>
    %99 = arith.subf %37, %98 : vector<48x128xf32>
    %100 = math.absf %99 : vector<48x128xf32>
    %cst_27 = arith.constant dense<0.000000e+00> : vector<128xf32>
    %101 = vector.multi_reduction <add>, %100, %cst_27 [0] : vector<48x128xf32> to vector<128xf32>
    %102 = vector.shape_cast %101 : vector<128xf32> to vector<1x128xf32>
    %103 = vector.extract_strided_slice %42 {offsets = [0, 10], sizes = [48, 1], strides = [1, 1]} : vector<48x16xf32> to vector<48x1xf32>
    %104 = vector.broadcast %103 : vector<48x1xf32> to vector<48x128xf32>
    %105 = arith.subf %37, %104 : vector<48x128xf32>
    %106 = math.absf %105 : vector<48x128xf32>
    %cst_28 = arith.constant dense<0.000000e+00> : vector<128xf32>
    %107 = vector.multi_reduction <add>, %106, %cst_28 [0] : vector<48x128xf32> to vector<128xf32>
    %108 = vector.shape_cast %107 : vector<128xf32> to vector<1x128xf32>
    %109 = vector.extract_strided_slice %42 {offsets = [0, 11], sizes = [48, 1], strides = [1, 1]} : vector<48x16xf32> to vector<48x1xf32>
    %110 = vector.broadcast %109 : vector<48x1xf32> to vector<48x128xf32>
    %111 = arith.subf %37, %110 : vector<48x128xf32>
    %112 = math.absf %111 : vector<48x128xf32>
    %cst_29 = arith.constant dense<0.000000e+00> : vector<128xf32>
    %113 = vector.multi_reduction <add>, %112, %cst_29 [0] : vector<48x128xf32> to vector<128xf32>
    %114 = vector.shape_cast %113 : vector<128xf32> to vector<1x128xf32>
    %115 = vector.extract_strided_slice %42 {offsets = [0, 12], sizes = [48, 1], strides = [1, 1]} : vector<48x16xf32> to vector<48x1xf32>
    %116 = vector.broadcast %115 : vector<48x1xf32> to vector<48x128xf32>
    %117 = arith.subf %37, %116 : vector<48x128xf32>
    %118 = math.absf %117 : vector<48x128xf32>
    %cst_30 = arith.constant dense<0.000000e+00> : vector<128xf32>
    %119 = vector.multi_reduction <add>, %118, %cst_30 [0] : vector<48x128xf32> to vector<128xf32>
    %120 = vector.shape_cast %119 : vector<128xf32> to vector<1x128xf32>
    %121 = vector.extract_strided_slice %42 {offsets = [0, 13], sizes = [48, 1], strides = [1, 1]} : vector<48x16xf32> to vector<48x1xf32>
    %122 = vector.broadcast %121 : vector<48x1xf32> to vector<48x128xf32>
    %123 = arith.subf %37, %122 : vector<48x128xf32>
    %124 = math.absf %123 : vector<48x128xf32>
    %cst_31 = arith.constant dense<0.000000e+00> : vector<128xf32>
    %125 = vector.multi_reduction <add>, %124, %cst_31 [0] : vector<48x128xf32> to vector<128xf32>
    %126 = vector.shape_cast %125 : vector<128xf32> to vector<1x128xf32>
    %127 = vector.extract_strided_slice %42 {offsets = [0, 14], sizes = [48, 1], strides = [1, 1]} : vector<48x16xf32> to vector<48x1xf32>
    %128 = vector.broadcast %127 : vector<48x1xf32> to vector<48x128xf32>
    %129 = arith.subf %37, %128 : vector<48x128xf32>
    %130 = math.absf %129 : vector<48x128xf32>
    %cst_32 = arith.constant dense<0.000000e+00> : vector<128xf32>
    %131 = vector.multi_reduction <add>, %130, %cst_32 [0] : vector<48x128xf32> to vector<128xf32>
    %132 = vector.shape_cast %131 : vector<128xf32> to vector<1x128xf32>
    %133 = vector.extract_strided_slice %42 {offsets = [0, 15], sizes = [48, 1], strides = [1, 1]} : vector<48x16xf32> to vector<48x1xf32>
    %134 = vector.broadcast %133 : vector<48x1xf32> to vector<48x128xf32>
    %135 = arith.subf %37, %134 : vector<48x128xf32>
    %136 = math.absf %135 : vector<48x128xf32>
    %cst_33 = arith.constant dense<0.000000e+00> : vector<128xf32>
    %137 = vector.multi_reduction <add>, %136, %cst_33 [0] : vector<48x128xf32> to vector<128xf32>
    %138 = vector.shape_cast %137 : vector<128xf32> to vector<1x128xf32>
    %139 = tpu.concatenate %48, %54, %60, %66, %72, %78, %84, %90, %96, %102, %108, %114, %120, %126, %132, %138 in 0 : vector<1x128xf32>, vector<1x128xf32>, vector<1x128xf32>, vector<1x128xf32>, vector<1x128xf32>, vector<1x128xf32>, vector<1x128xf32>, vector<1x128xf32>, vector<1x128xf32>, vector<1x128xf32>, vector<1x128xf32>, vector<1x128xf32>, vector<1x128xf32>, vector<1x128xf32>, vector<1x128xf32>, vector<1x128xf32> -> vector<16x128xf32>
    %cst_34 = arith.constant 0.00999999977 : f32
    %140 = vector.broadcast %cst_34 : f32 to vector<16x128xf32>
    %141 = arith.mulf %140, %139 : vector<16x128xf32>
    %cst_35 = arith.constant 1.000000e+00 : f32
    %142 = vector.broadcast %cst_35 : f32 to vector<16x128xf32>
    %143 = arith.mulf %142, %141 : vector<16x128xf32>
    %cst_36 = arith.constant 1.000000e+00 : f32
    %144 = vector.broadcast %cst_36 : f32 to vector<1x128xf32>
    %145 = arith.mulf %144, %30 : vector<1x128xf32>
    %146 = vector.broadcast %145 : vector<1x128xf32> to vector<16x128xf32>
    %147 = arith.addf %143, %146 : vector<16x128xf32>
    %c0_37 = arith.constant 0 : index
    %c0_38 = arith.constant 0 : index
    %148 = vector.load %arg6[%c0_37, %c0_38] : memref<16x128xf32, #tpu.memory_space<vmem>>, vector<16x128xf32>
    tpu.vector_store %arg6[%c0_37, %c0_38], %147 {strides = array<i32>} : memref<16x128xf32, #tpu.memory_space<vmem>>, vector<16x128xf32>,
    return
  }
  func.func @transform_0(%arg0: i32) -> (i32, i32) {
    %c0_i32 = arith.constant 0 : i32
    %c0_i32_0 = arith.constant 0 : i32
    return %c0_i32, %arg0 : i32, i32
  }
  func.func @transform_1(%arg0: i32) -> (i32, i32) {
    %c0_i32 = arith.constant 0 : i32
    %c0_i32_0 = arith.constant 0 : i32
    return %c0_i32, %arg0 : i32, i32
  }
  func.func @transform_2(%arg0: i32) -> (i32, i32) {
    %c0_i32 = arith.constant 0 : i32
    %c0_i32_0 = arith.constant 0 : i32
    %c0_i32_1 = arith.constant 0 : i32
    return %c0_i32, %c0_i32_0 : i32, i32
  }
  func.func @transform_3(%arg0: i32) -> (i32, i32) {
    %c0_i32 = arith.constant 0 : i32
    %c0_i32_0 = arith.constant 0 : i32
    %c0_i32_1 = arith.constant 0 : i32
    return %c0_i32, %c0_i32_0 : i32, i32
  }
  func.func @transform_4(%arg0: i32) -> (i32, i32) {
    %c0_i32 = arith.constant 0 : i32
    %c0_i32_0 = arith.constant 0 : i32
    %c0_i32_1 = arith.constant 0 : i32
    return %c0_i32, %c0_i32_0 : i32, i32
  }
  func.func @transform_5(%arg0: i32) -> (i32, i32) {
    %c0_i32 = arith.constant 0 : i32
    %c0_i32_0 = arith.constant 0 : i32
    return %c0_i32, %arg0 : i32, i32
  }
}

</mosaic_0001>

<bundles_post_ra>
// kernel: tpu_custom_call.1
= control target key start
LH: loop header
LB: loop body
LE: loop exit
PB: predicated region body
PF: predicated region fallthrough
CT: control target
= control target key end

     0   :  { %v1055_v2 = vmov 0   ;;  %s1545_s0 = inlined_call_operand.vmem [shape: f32[1,128], index: 0, kind: input, shape index: {}]   ;;  %s1546_s1 = inlined_call_operand.vmem [shape: f32[48,128], index: 1, kind: input, shape index: {}]   ;;  %s1547_s2 = inlined_call_operand.vmem [shape: f32[48,16], index: 2, kind: input, shape index: {}]   ;;  %s1548_s3 = inlined_call_operand.vmem [shape: f32[48,1], index: 3, kind: input, shape index: {}]   ;;  %s1549_s4 = inlined_call_operand.vmem [shape: f32[48,1], index: 4, kind: input, shape index: {}]   ;;  %s1550_s5 = inlined_call_operand.hbm [shape: f32[16,128], index: 5, kind: output, shape index: {}]  }
   0x1   :  { %v46_v0 = vld [vmem:[%s1548_s3 + $0x10] sm:$0xff]  ;;  %v44_v1 = vld [vmem:[%s1548_s3] sm:$0xff]  ;;  %980 = vset.pattern.permute.xlu1 %v1055_v2  ;;  %979 = vset.pattern.permute.xlu0 %v1055_v2  ;;  %v47_v3 = vld [vmem:[%s1548_s3 + $0x18] sm:$0xff] }
   0x2   :  { %74 = vperm.xlu1 %980, %v46_v0   ;;  %64 = vperm.xlu0 %979, %v44_v1   ;;  %v45_v4 = vld [vmem:[%s1548_s3 + $0x8] sm:$0xff]  ;;  %v48_v6 = vld [vmem:[%s1548_s3 + $0x20] sm:$0xff] }
   0x3   :  { %v49_v5 = vld [vmem:[%s1548_s3 + $0x28] sm:$0xff] }
   0x6   :  { %79 = vperm.xlu1 %980, %v47_v3   ;;  %69 = vperm.xlu0 %979, %v45_v4  }
   0x7   :  { %10 = vsyncpa [#allocation3], 0  ;;  %v51_v7 = vld [vmem:[%s1549_s4 + $0x8] sm:$0xff]  ;;  %v50_v8 = vld [vmem:[%s1549_s4] sm:$0xff]  ;;  %v1056_v46 = vmov 1   ;;  %v1057_v47 = vmov 2  }
   0x8   :  { %v53_v9 = vld [vmem:[%s1549_s4 + $0x18] sm:$0xff]  ;;  %v52_v10 = vld [vmem:[%s1549_s4 + $0x10] sm:$0xff]  ;;  %v55_v11 = vld [vmem:[%s1549_s4 + $0x28] sm:$0xff]  ;;  %v1058_v48 = vmov 3   ;;  %v1059_v49 = vmov 4   ;;  %v1060_v50 = vmov 5  }
   0x9   :  { %v54_v12 = vld [vmem:[%s1549_s4 + $0x20] sm:$0xff]  ;;  %v135_v19 = vld [vmem:[%s1547_s2 + $0x8] sm:$0xff]  ;;  %v136_v25 = vld [vmem:[%s1547_s2 + $0x10] sm:$0xff]  ;;  %v1061_v51 = vmov 6   ;;  %v1062_v52 = vmov 7   ;;  %v1063_v53 = vmov 8  }
   0xa   :  { %89 = vperm.xlu1 %980, %v49_v5   ;;  %84 = vperm.xlu0 %979, %v48_v6   ;;  %v56_v17 = vld [vmem:[%s1546_s1] sm:$0xff]  ;;  %v137_v26 = vld [vmem:[%s1547_s2 + $0x18] sm:$0xff]  ;;  %v139_v34 = vld [vmem:[%s1547_s2 + $0x28] sm:$0xff]  ;;  %v1064_v54 = vmov 9   ;;  %v1065_v55 = vmov 10   ;;  %v1066_v57 = vmov 11  }
   0xb   :  { %v134_v18 = vld [vmem:[%s1547_s2] sm:$0xff]  ;;  %v57_v56 = vld [vmem:[%s1546_s1 + $0x8] sm:$0xff]  ;;  %v58_v58 = vld [vmem:[%s1546_s1 + $0x10] sm:$0xff]  ;;  %vm910_vm0 = vcmask 1040384   ;;  %vm912_vm1 = vcmask 1041408   ;;  %vm914_vm2 = vcmask 1042432  }
   0xc   :  { %v138_v35 = vld [vmem:[%s1547_s2 + $0x20] sm:$0xff]  ;;  %v59_v60 = vld [vmem:[%s1546_s1 + $0x18] sm:$0xff]  ;;  %vm916_vm3 = vcmask 1043456   ;;  %vm918_vm4 = vcmask 1044480   ;;  %vm920_vm5 = vcmask 1045504   ;;  %vm922_vm6 = vcmask 1046528  }
   0xd   :  { %v60_v4 = vld [vmem:[%s1546_s1 + $0x20] sm:$0xff] }
   0xe   :  { %105 = vperm.xlu1 %980, %v51_v7   ;;  %100 = vperm.xlu0 %979, %v50_v8  }
  0x12   :  { %115 = vperm.xlu1 %980, %v53_v9   ;;  %110 = vperm.xlu0 %979, %v52_v10   ;;  %v1067_v10 = vmov 12  }
  0x16   :  { %125 = vperm.xlu1 %980, %v55_v11   ;;  %120 = vperm.xlu0 %979, %v54_v12  }
  0x81   :  { %v1140_v13 = vpop.permute.xlu1 %74  ;;  %v65_v14 = vpop.permute.xlu0 %64 }
  0x82   :  { %v92_v22 = vmul.f32 %v65_v14, %v56_v17  ;;  %v140_v23 = vmul.f32 %v134_v18, %v65_v14  ;;  %v142_v32 = vmul.f32 %v136_v25, %v1140_v13  ;;  %v94_v62 = vmul.f32 %v1140_v13, %v58_v58 }
  0x85   :  { %v1142_v15 = vpop.permute.xlu1 %79  ;;  %v1144_v16 = vpop.permute.xlu0 %69 }
  0x86   :  { %v141_v24 = vmul.f32 %v135_v19, %v1144_v16  ;;  %v143_v33 = vmul.f32 %v137_v26, %v1142_v15  ;;  %v93_v59 = vmul.f32 %v1144_v16, %v57_v56  ;;  %v95_v1 = vmul.f32 %v1142_v15, %v59_v60 }
  0x89   :  { %v1155_v20 = vpop.permute.xlu1 %89  ;;  %v1157_v21 = vpop.permute.xlu0 %84 }
  0x8a   :  { %v145_v40 = vmul.f32 %v139_v34, %v1155_v20  ;;  %v144_v41 = vmul.f32 %v138_v35, %v1157_v21  ;;  %v96_v12 = vmul.f32 %v1157_v21, %v60_v4  ;;  %v61_v35 = vld [vmem:[%s1546_s1 + $0x28] sm:$0xff] }
  0x8d   :  { %v1166_v27 = vpop.permute.xlu1 %105  ;;  %v101_v28 = vpop.permute.xlu0 %100 }
  0x8e   :  { %v1169_v29 = vadd.f32 %v141_v24, %v1166_v27  ;;  %v1171_v30 = vadd.f32 %v101_v28, %v92_v22  ;;  %v1173_v31 = vadd.f32 %v140_v23, %v101_v28  ;;  %v1277_v61 = vadd.f32 %v1166_v27, %v93_v59 }
  0x8f   :  { %v1068_v24 = vmov 14  }
  0x90   :  { %159 = vperm.xlu1 %980, %v1169_v29   ;;  %154 = vperm.xlu0 %979, %v1173_v31  }
  0x91   :  { %v1185_v36 = vpop.permute.xlu1 %115  ;;  %v1187_v37 = vpop.permute.xlu0 %110 }
  0x92   :  { %v1190_v38 = vadd.f32 %v143_v33, %v1185_v36  ;;  %v1193_v39 = vadd.f32 %v142_v32, %v1187_v37  ;;  %v1289_v5 = vadd.f32 %v1185_v36, %v95_v1  ;;  %v1292_v6 = vadd.f32 %v1187_v37, %v94_v62 }
  0x94   :  { %169 = vperm.xlu1 %980, %v1190_v38   ;;  %164 = vperm.xlu0 %979, %v1193_v39  }
  0x95   :  { %v1199_v42 = vpop.permute.xlu1 %125  ;;  %v1201_v43 = vpop.permute.xlu0 %120 }
  0x96   :  { %v1204_v44 = vadd.f32 %v145_v40, %v1199_v42  ;;  %v1207_v45 = vadd.f32 %v144_v41, %v1201_v43  ;;  %v1301_v15 = vadd.f32 %v1201_v43, %v96_v12  ;;  %v97_v43 = vmul.f32 %v1155_v20, %v61_v35 }
  0x98   :  { %179 = vperm.xlu1 %980, %v1204_v44   ;;  %174 = vperm.xlu0 %979, %v1207_v45  }
  0x9c   :  { %982 = vset.pattern.permute.xlu1 %v1056_v46  ;;  %981 = vset.pattern.permute.xlu0 %v1056_v46 }
  0x9d   :  { %210 = vperm.xlu1 %982, %v1169_v29   ;;  %206 = vperm.xlu0 %981, %v1173_v31  }
  0xa1   :  { %214 = vperm.xlu1 %982, %v1193_v39   ;;  %218 = vperm.xlu0 %981, %v1190_v38  }
  0xa5   :  { %222 = vperm.xlu1 %982, %v1207_v45   ;;  %226 = vperm.xlu0 %981, %v1204_v44  }
  0xa9   :  { %983 = vset.pattern.permute.xlu1 %v1057_v47  ;;  %984 = vset.pattern.permute.xlu0 %v1057_v47 }
  0xaa   :  { %253 = vperm.xlu1 %983, %v1173_v31   ;;  %257 = vperm.xlu0 %984, %v1169_v29  }
  0xae   :  { %261 = vperm.xlu1 %983, %v1193_v39   ;;  %269 = vperm.xlu0 %984, %v1207_v45  }
  0xb2   :  { %265 = vperm.xlu1 %983, %v1190_v38   ;;  %985 = vset.pattern.permute.xlu0 %v1058_v48 }
  0xb3   :  { %300 = vperm.xlu0 %985, %v1173_v31  }
  0xb6   :  { %273 = vperm.xlu1 %983, %v1204_v44  }
  0xb7   :  { %312 = vperm.xlu0 %985, %v1190_v38  }
  0xba   :  { %986 = vset.pattern.permute.xlu1 %v1058_v48  ;;  %v1069_v48 = vmov 13  }
  0xbb   :  { %304 = vperm.xlu1 %986, %v1169_v29   ;;  %320 = vperm.xlu0 %985, %v1204_v44  }
  0xbf   :  { %308 = vperm.xlu1 %986, %v1193_v39   ;;  %988 = vset.pattern.permute.xlu0 %v1059_v49 }
  0xc0   :  { %351 = vperm.xlu0 %988, %v1169_v29  }
  0xc3   :  { %316 = vperm.xlu1 %986, %v1207_v45  }
  0xc4   :  { %363 = vperm.xlu0 %988, %v1207_v45  }
  0xc7   :  { %987 = vset.pattern.permute.xlu1 %v1059_v49  ;;  %v1322_v49 = vadd.f32 %v1199_v42, %v97_v43 }
  0xc8   :  { %347 = vperm.xlu1 %987, %v1173_v31   ;;  %989 = vset.pattern.permute.xlu0 %v1060_v50 }
  0xc9   :  { %394 = vperm.xlu0 %989, %v1173_v31  }
  0xcc   :  { %355 = vperm.xlu1 %987, %v1193_v39  }
  0xcd   :  { %406 = vperm.xlu0 %989, %v1190_v38  }
  0xd0   :  { %359 = vperm.xlu1 %987, %v1190_v38  }
  0xd1   :  { %414 = vperm.xlu0 %989, %v1204_v44  }
  0xd4   :  { %367 = vperm.xlu1 %987, %v1204_v44  }
  0xd5   :  { %992 = vset.pattern.permute.xlu0 %v1061_v51 }
  0xd6   :  { %445 = vperm.xlu0 %992, %v1169_v29  }
  0xd8   :  { %990 = vset.pattern.permute.xlu1 %v1060_v50 }
  0xd9   :  { %398 = vperm.xlu1 %990, %v1169_v29  }
  0xda   :  { %457 = vperm.xlu0 %992, %v1207_v45  }
  0xdd   :  { %402 = vperm.xlu1 %990, %v1193_v39  }
  0xde   :  { %993 = vset.pattern.permute.xlu0 %v1062_v52 }
  0xdf   :  { %488 = vperm.xlu0 %993, %v1173_v31  }
  0xe1   :  { %410 = vperm.xlu1 %990, %v1207_v45  }
  0xe3   :  { %500 = vperm.xlu0 %993, %v1190_v38  }
  0xe5   :  { %991 = vset.pattern.permute.xlu1 %v1061_v51 }
  0xe6   :  { %441 = vperm.xlu1 %991, %v1173_v31  }
  0xe7   :  { %508 = vperm.xlu0 %993, %v1204_v44  }
  0xea   :  { %449 = vperm.xlu1 %991, %v1193_v39  }
  0xeb   :  { %996 = vset.pattern.permute.xlu0 %v1063_v53 }
  0xec   :  { %539 = vperm.xlu0 %996, %v1169_v29  }
  0xee   :  { %453 = vperm.xlu1 %991, %v1190_v38  }
  0xf0   :  { %551 = vperm.xlu0 %996, %v1207_v45  }
  0xf2   :  { %461 = vperm.xlu1 %991, %v1204_v44  }
  0xf4   :  { %997 = vset.pattern.permute.xlu0 %v1064_v54 }
  0xf5   :  { %582 = vperm.xlu0 %997, %v1173_v31  }
  0xf6   :  { %994 = vset.pattern.permute.xlu1 %v1062_v52 }
  0xf7   :  { %492 = vperm.xlu1 %994, %v1169_v29  }
  0xf9   :  { %594 = vperm.xlu0 %997, %v1190_v38  }
  0xfb   :  { %496 = vperm.xlu1 %994, %v1193_v39  }
  0xfd   :  { %602 = vperm.xlu0 %997, %v1204_v44  }
  0xff   :  { %504 = vperm.xlu1 %994, %v1207_v45  }
 0x101   :  { %1000 = vset.pattern.permute.xlu0 %v1065_v55 }
 0x102   :  { %633 = vperm.xlu0 %1000, %v1169_v29  }
 0x103   :  { %995 = vset.pattern.permute.xlu1 %v1063_v53 }
 0x104   :  { %535 = vperm.xlu1 %995, %v1173_v31  }
 0x106   :  { %645 = vperm.xlu0 %1000, %v1207_v45  }
 0x108   :  { %543 = vperm.xlu1 %995, %v1193_v39  }
 0x10a   :  { %1001 = vset.pattern.permute.xlu0 %v1066_v57 }
 0x10b   :  { %676 = vperm.xlu0 %1001, %v1173_v31  }
 0x10c   :  { %547 = vperm.xlu1 %995, %v1190_v38  }
 0x10f   :  { %v160_v63 = vpop.permute.xlu1 %159  ;;  %688 = vperm.xlu0 %1001, %v1190_v38   ;;  %v155_v0 = vpop.permute.xlu0 %154 }
 0x110   :  { %v183_v2 = vsub.f32 %v1277_v61, %v160_v63  ;;  %v182_v3 = vsub.f32 %v1171_v30, %v155_v0  ;;  %555 = vperm.xlu1 %995, %v1204_v44  }
 0x112   :  { %v189_v7 = vand.u32 2147483647, %v183_v2  ;;  %v188_v8 = vand.u32 2147483647, %v182_v3 }
 0x113   :  { %v170_v9 = vpop.permute.xlu1 %169  ;;  %1003 = vset.pattern.permute.xlu0 %v1067_v10  ;;  %v165_v11 = vpop.permute.xlu0 %164 }
 0x114   :  { %v185_v13 = vsub.f32 %v1289_v5, %v170_v9  ;;  %v184_v14 = vsub.f32 %v1292_v6, %v165_v11  ;;  %998 = vset.pattern.permute.xlu1 %v1064_v54  ;;  %723 = vperm.xlu0 %1003, %v1173_v31   ;;  %v194_v16 = vadd.f32 %v189_v7, %v188_v8 }
 0x115   :  { %586 = vperm.xlu1 %998, %v1169_v29  }
 0x116   :  { %v190_v17 = vand.u32 2147483647, %v184_v14  ;;  %v191_v22 = vand.u32 2147483647, %v185_v13  ;;  %v1070_v14 = vmov 15  }
 0x117   :  { %v180_v18 = vpop.permute.xlu1 %179  ;;  %v175_v19 = vpop.permute.xlu0 %174 }
 0x118   :  { %v195_v23 = vadd.f32 %v194_v16, %v190_v17  ;;  %v186_v21 = vsub.f32 %v1301_v15, %v175_v19  ;;  %1008 = vset.pattern.permute.xlu0 %v1068_v24  ;;  %v187_v58 = vsub.f32 %v1322_v49, %v180_v18 }
 0x119   :  { %590 = vperm.xlu1 %998, %v1193_v39   ;;  %821 = vperm.xlu0 %1008, %v1169_v29  }
 0x11a   :  { %v196_v25 = vadd.f32 %v195_v23, %v191_v22  ;;  %v192_v26 = vand.u32 2147483647, %v186_v21  ;;  %v193_v3 = vand.u32 2147483647, %v187_v58 }
 0x11c   :  { %v197_v27 = vadd.f32 %v196_v25, %v192_v26  ;;  %v211_v28 = vpop.permute.xlu1 %210  ;;  %v207_v32 = vpop.permute.xlu0 %206 }
 0x11d   :  { %v230_v33 = vsub.f32 %v1277_v61, %v211_v28  ;;  %v229_v34 = vsub.f32 %v1171_v30, %v207_v32  ;;  %598 = vperm.xlu1 %998, %v1207_v45   ;;  %829 = vperm.xlu0 %1008, %v1190_v38  }
 0x11e   :  { %v198_v7 = vadd.f32 %v197_v27, %v193_v3  ;;  %v21_v3 = vld [vmem:[%s1545_s0] sm:$0x1]  ;;  %s1071_s0 = smov [#allocation2]  }
 0x11f   :  { %v236_v36 = vand.u32 2147483647, %v230_v33  ;;  %v235_v37 = vand.u32 2147483647, %v229_v34  ;;  %s948_s13 = sshll.u32 %s1071_s0, 4  ;;  %s949_s13 = int_to_ptr.vmem [resolvable:$true] %s948_s13 }
 0x120   :  { %v215_v40 = vpop.permute.xlu1 %214  ;;  %v219_v41 = vpop.permute.xlu0 %218  ;;  %v199_v18 = vrot.slane %v198_v7, 4  ;;  %s1031_s14 = scalar_lea.vmem %s949_s13, 256  ;;  %p1036_p1 = scmp.lt.s32.totalorder %s949_s13, %s949_s13 }
 0x121   :  { %v231_v46 = vsub.f32 %v1292_v6, %v215_v40  ;;  %v232_v47 = vsub.f32 %v1289_v5, %v219_v41  ;;  %999 = vset.pattern.permute.xlu1 %v1065_v55  ;;  %1015 = vset.pattern.permute.xlu0 %v1069_v48  ;;  %v241_v50 = vadd.f32 %v236_v36, %v235_v37  ;;  %p1032_p0 = scmp.ne.s32.totalorder %s949_s13, %s1031_s14  ;;  %p1037_p2 = scmp.lt.s32.totalorder %s1031_s14, %s1031_s14 }
 0x122   :  { %629 = vperm.xlu1 %999, %v1173_v31   ;;  %774 = vperm.xlu0 %1015, %v1169_v29   ;;  %v200_v32 = vadd.f32 %v199_v18, %v198_v7 }
 0x123   :  { %v237_v51 = vand.u32 2147483647, %v231_v46  ;;  %v238_v54 = vand.u32 2147483647, %v232_v47  ;;  %p1038_p3 = por %p1037_p2, %p1036_p1 }
 0x124   :  { %v223_v52 = vpop.permute.xlu1 %222  ;;  %v227_v20 = vpop.permute.xlu0 %226  ;;  %v201_v43 = vrot.slane %v200_v32, 2 }
 0x125   :  { %v242_v53 = vadd.f32 %v241_v50, %v237_v51  ;;  %v233_v56 = vsub.f32 %v1301_v15, %v223_v52  ;;  %v234_v55 = vsub.f32 %v1322_v49, %v227_v20  ;;  %p1039_p4 = pnand %p1038_p3, %p1032_p0 }
 0x126   :  { %637 = vperm.xlu1 %999, %v1193_v39   ;;  %782 = vperm.xlu0 %1015, %v1190_v38   ;;  %v202_v20 = vadd.f32 %v201_v43, %v200_v32 }
 0x127   :  { %v243_v59 = vadd.f32 %v242_v53, %v238_v54  ;;  %v239_v60 = vand.u32 2147483647, %v233_v56  ;;  %v240_v62 = vand.u32 2147483647, %v234_v55 }
 0x129   :  { %v244_v42 = vadd.f32 %v243_v59, %v239_v60  ;;  %v254_v63 = vpop.permute.xlu1 %253  ;;  %v258_v0 = vpop.permute.xlu0 %257  ;;  %v203_v59 = vrot.slane %v202_v20, 1 }
 0x12a   :  { %v276_v1 = vsub.f32 %v1171_v30, %v254_v63  ;;  %v277_v2 = vsub.f32 %v1277_v61, %v258_v0  ;;  %641 = vperm.xlu1 %999, %v1190_v38   ;;  %790 = vperm.xlu0 %1015, %v1204_v44  }
 0x12b   :  { %v245_v4 = vadd.f32 %v244_v42, %v240_v62  ;;  %v204_v0 = vadd.f32 %v203_v59, %v202_v20 }
 0x12c   :  { %v282_v11 = vand.u32 2147483647, %v276_v1  ;;  %v283_v12 = vand.u32 2147483647, %v277_v2 }
 0x12d   :  { %v262_v8 = vpop.permute.xlu1 %261  ;;  %v270_v9 = vpop.permute.xlu0 %269  ;;  %v246_v16 = vrot.slane %v245_v4, 4 }
 0x12e   :  { %v278_v13 = vsub.f32 %v1292_v6, %v262_v8  ;;  %649 = vperm.xlu1 %999, %v1204_v44   ;;  %1020 = vset.pattern.permute.xlu0 %v1070_v14  ;;  %v288_v22 = vadd.f32 %v283_v12, %v282_v11  ;;  %v280_v23 = vsub.f32 %v1301_v15, %v270_v9  ;;  %v959_v8 = vmul.f32 -1.442695, %v21_v3 }
 0x12f   :  { %868 = vperm.xlu0 %1020, %v1169_v29   ;;  %v247_v25 = vadd.f32 %v246_v16, %v245_v4 }
 0x130   :  { %v284_v17 = vand.u32 2147483647, %v278_v13  ;;  %v286_v34 = vand.u32 2147483647, %v280_v23  ;;  %1023 = vpow2.f32 %v959_v8 }
 0x131   :  { %v266_v19 = vpop.permute.xlu1 %265  ;;  %v248_v37 = vrot.slane %v247_v25, 2 }
 0x132   :  { %v279_v21 = vsub.f32 %v1289_v5, %v266_v19  ;;  %1002 = vset.pattern.permute.xlu1 %v1066_v57  ;;  %v1340_v26 = vpop.permute.xlu0 %300  ;;  %v289_v27 = vadd.f32 %v288_v22, %v284_v17 }
 0x133   :  { %680 = vperm.xlu1 %1002, %v1169_v29   ;;  %876 = vperm.xlu0 %1020, %v1190_v38   ;;  %v249_v51 = vadd.f32 %v248_v37, %v247_v25 }
 0x134   :  { %v285_v28 = vand.u32 2147483647, %v279_v21 }
 0x135   :  { %v274_v33 = vpop.permute.xlu1 %273  ;;  %v250_v56 = vrot.slane %v249_v51, 1 }
 0x136   :  { %v290_v35 = vadd.f32 %v289_v27, %v285_v28  ;;  %v281_v36 = vsub.f32 %v1322_v49, %v274_v33  ;;  %v1347_v46 = vpop.permute.xlu0 %312  ;;  %v323_v27 = vsub.f32 %v1171_v30, %v1340_v26 }
 0x137   :  { %684 = vperm.xlu1 %1002, %v1193_v39   ;;  %884 = vperm.xlu0 %1020, %v1204_v44   ;;  %v251_v62 = vadd.f32 %v250_v56, %v249_v51 }
 0x138   :  { %v287_v40 = vand.u32 2147483647, %v281_v36  ;;  %v291_v41 = vadd.f32 %v290_v35, %v286_v34  ;;  %v329_v37 = vand.u32 2147483647, %v323_v27 }
 0x13a   :  { %v292_v47 = vadd.f32 %v291_v41, %v287_v40  ;;  %v305_v50 = vpop.permute.xlu1 %304  ;;  %v1350_v55 = vpop.permute.xlu0 %320 }
 0x13b   :  { %692 = vperm.xlu1 %1002, %v1207_v45   ;;  %v1024_v17 = vpop.eup %1023  ;;  %v324_v23 = vsub.f32 %v1277_v61, %v305_v50 }
 0x13c   :  { %v293_v52 = vrot.slane %v292_v47, 4  ;;  %v25_v22 = vadd.f32 1.0, %v1024_v17 }
 0x13d   :  { %v330_v33 = vand.u32 2147483647, %v324_v23  ;;  %v328_v23 = vsub.f32 %v1322_v49, %v1350_v55 }
 0x13e   :  { %v294_v53 = vadd.f32 %v293_v52, %v292_v47  ;;  %v309_v54 = vpop.permute.xlu1 %308  ;;  %1025 = vrcp.f32 %v25_v22  ;;  %v326_v47 = vsub.f32 %v1289_v5, %v1347_v46 }
 0x13f   :  { %1004 = vset.pattern.permute.xlu1 %v1067_v10  ;;  %v352_v1 = vpop.permute.xlu0 %351  ;;  %v325_v28 = vsub.f32 %v1292_v6, %v309_v54  ;;  %v335_v50 = vadd.f32 %v330_v33, %v329_v37 }
 0x140   :  { %v295_v58 = vrot.slane %v294_v53, 2  ;;  %727 = vperm.xlu1 %1004, %v1169_v29   ;;  %v911_v29 = vsel %vm910_vm0, %v204_v0, %v251_v62  ;;  %v371_v41 = vsub.f32 %v1277_v61, %v352_v1  ;;  %v332_v1 = vand.u32 2147483647, %v326_v47 }
 0x141   :  { %v331_v40 = vand.u32 2147483647, %v325_v28 }
 0x142   :  { %v296_v60 = vadd.f32 %v295_v58, %v294_v53  ;;  %v1354_v42 = vpop.permute.xlu1 %316  ;;  %v377_v59 = vand.u32 2147483647, %v371_v41  ;;  %v334_v41 = vand.u32 2147483647, %v328_v23 }
 0x143   :  { %v1367_v9 = vpop.permute.xlu0 %363  ;;  %v327_v20 = vsub.f32 %v1301_v15, %v1354_v42  ;;  %v336_v58 = vadd.f32 %v335_v50, %v331_v40 }
 0x144   :  { %v297_v63 = vrot.slane %v296_v60, 1  ;;  %1005 = vset.pattern.permute.xlu1 %v1069_v48 }
 0x145   :  { %770 = vperm.xlu1 %1005, %v1173_v31   ;;  %v337_v17 = vadd.f32 %v336_v58, %v332_v1 }
 0x146   :  { %v298_v2 = vadd.f32 %v297_v63, %v296_v60 }
 0x147   :  { %v348_v4 = vpop.permute.xlu1 %347 }
 0x148   :  { %v1363_v7 = vsel %vm912_vm1, %v911_v29, %v298_v2  ;;  %v395_v13 = vpop.permute.xlu0 %394  ;;  %v1401_v46 = vpop.eup %1025  ;;  %v333_v29 = vand.u32 2147483647, %v327_v20 }
 0x149   :  { %1006 = vset.pattern.permute.xlu1 %v1067_v10  ;;  %v417_v35 = vsub.f32 %v1171_v30, %v395_v13 }
 0x14a   :  { %731 = vperm.xlu1 %1006, %v1193_v39  }
 0x14b   :  { %v356_v11 = vpop.permute.xlu1 %355  ;;  %v423_v53 = vand.u32 2147483647, %v417_v35 }
 0x14c   :  { %v407_v18 = vpop.permute.xlu0 %406  ;;  %v372_v26 = vsub.f32 %v1292_v6, %v356_v11 }
 0x14d   :  { %v420_v63 = vsub.f32 %v1289_v5, %v407_v18 }
 0x14e   :  { %1007 = vset.pattern.permute.xlu1 %v1068_v24  ;;  %v378_v60 = vand.u32 2147483647, %v372_v26 }
 0x14f   :  { %817 = vperm.xlu1 %1007, %v1173_v31   ;;  %v360_v12 = vpop.permute.xlu1 %359 }
 0x150   :  { %v1378_v25 = vpop.permute.xlu0 %414  ;;  %v373_v52 = vsub.f32 %v1289_v5, %v360_v12 }
 0x152   :  { %v379_v3 = vand.u32 2147483647, %v373_v52 }
 0x153   :  { %1009 = vset.pattern.permute.xlu1 %v1069_v48  ;;  %v1372_v16 = vpop.permute.xlu1 %367 }
 0x154   :  { %778 = vperm.xlu1 %1009, %v1193_v39  }
 0x158   :  { %1010 = vset.pattern.permute.xlu1 %v1070_v14  ;;  %v399_v19 = vpop.permute.xlu1 %398 }
 0x159   :  { %864 = vperm.xlu1 %1010, %v1173_v31   ;;  %v418_v32 = vsub.f32 %v1277_v61, %v399_v19  ;;  %v370_v31 = vsub.f32 %v1171_v30, %v348_v4  ;;  %v374_v4 = vsub.f32 %v1301_v15, %v1367_v9  ;;  %v375_v9 = vsub.f32 %v1322_v49, %v1372_v16 }
 0x15a   :  { %v422_v16 = vsub.f32 %v1322_v49, %v1378_v25 }
 0x15b   :  { %v424_v43 = vand.u32 2147483647, %v418_v32  ;;  %v376_v51 = vand.u32 2147483647, %v370_v31  ;;  %v380_v33 = vand.u32 2147483647, %v374_v4 }
 0x15c   :  { %v403_v21 = vpop.permute.xlu1 %402  ;;  %v428_v25 = vand.u32 2147483647, %v422_v16 }
 0x15d   :  { %1011 = vset.pattern.permute.xlu1 %v1067_v10  ;;  %v419_v36 = vsub.f32 %v1292_v6, %v403_v21  ;;  %v429_v0 = vadd.f32 %v424_v43, %v423_v53  ;;  %v382_v2 = vadd.f32 %v377_v59, %v376_v51  ;;  %v426_v21 = vand.u32 2147483647, %v420_v63 }
 0x15e   :  { %735 = vperm.xlu1 %1011, %v1190_v38   ;;  %v446_v38 = vpop.permute.xlu0 %445  ;;  %v381_v43 = vand.u32 2147483647, %v375_v9  ;;  %v38_v53 = vadd.f32 1e-08, %v1401_v46 }
 0x15f   :  { %v425_v54 = vand.u32 2147483647, %v419_v36  ;;  %v465_v42 = vsub.f32 %v1277_v61, %v446_v38  ;;  %v383_v18 = vadd.f32 %v382_v2, %v378_v60  ;;  %v338_v36 = vadd.f32 %v337_v17, %v333_v29 }
 0x160   :  { %v411_v34 = vpop.permute.xlu1 %410 }
 0x161   :  { %v430_v11 = vadd.f32 %v429_v0, %v425_v54  ;;  %v421_v12 = vsub.f32 %v1301_v15, %v411_v34  ;;  %v384_v27 = vadd.f32 %v383_v18, %v379_v3  ;;  %v471_v28 = vand.u32 2147483647, %v465_v42 }
 0x162   :  { %1012 = vset.pattern.permute.xlu1 %v1068_v24  ;;  %v458_v8 = vpop.permute.xlu0 %457  ;;  %v339_v54 = vadd.f32 %v338_v36, %v334_v41 }
 0x163   :  { %825 = vperm.xlu1 %1012, %v1193_v39   ;;  %v427_v31 = vand.u32 2147483647, %v421_v12  ;;  %v431_v34 = vadd.f32 %v430_v11, %v426_v21  ;;  %v468_v55 = vsub.f32 %v1301_v15, %v458_v8  ;;  %v385_v47 = vadd.f32 %v384_v27, %v380_v33 }
 0x164   :  { %v340_v2 = vrot.slane %v339_v54, 4 }
 0x165   :  { %v442_v56 = vpop.permute.xlu1 %441  ;;  %v432_v52 = vadd.f32 %v431_v34, %v427_v31  ;;  %v386_v60 = vadd.f32 %v385_v47, %v381_v43 }
 0x166   :  { %v464_v62 = vsub.f32 %v1171_v30, %v442_v56  ;;  %v489_v26 = vpop.permute.xlu0 %488  ;;  %v474_v56 = vand.u32 2147483647, %v468_v55  ;;  %v341_v12 = vadd.f32 %v340_v2, %v339_v54 }
 0x167   :  { %1013 = vset.pattern.permute.xlu1 %v1070_v14  ;;  %v433_v0 = vadd.f32 %v432_v52, %v428_v25  ;;  %v511_v42 = vsub.f32 %v1171_v30, %v489_v26  ;;  %v387_v4 = vrot.slane %v386_v60, 4 }
 0x168   :  { %872 = vperm.xlu1 %1013, %v1193_v39   ;;  %v470_v19 = vand.u32 2147483647, %v464_v62  ;;  %v1412_v39 = vsub.f32 1.0, %v1401_v46 }
 0x169   :  { %v450_v13 = vpop.permute.xlu1 %449  ;;  %v434_v8 = vrot.slane %v433_v0, 4  ;;  %v517_v18 = vand.u32 2147483647, %v511_v42 }
 0x16a   :  { %v466_v22 = vsub.f32 %v1292_v6, %v450_v13  ;;  %v476_v37 = vadd.f32 %v471_v28, %v470_v19  ;;  %v31_v38 = vadd.f32 1e-08, %v1412_v39  ;;  %v501_v1 = vpop.permute.xlu0 %500 }
 0x16b   :  { %v514_v19 = vsub.f32 %v1289_v5, %v501_v1  ;;  %v435_v21 = vadd.f32 %v434_v8, %v433_v0 }
 0x16c   :  { %v472_v32 = vand.u32 2147483647, %v466_v22  ;;  %1014 = vset.pattern.permute.xlu1 %v1067_v10  ;;  %1027 = vlog2.f32 %v31_v38 }
 0x16d   :  { %739 = vperm.xlu1 %1014, %v1207_v45   ;;  %v454_v35 = vpop.permute.xlu1 %453  ;;  %1029 = vlog2.f32 %v38_v53  ;;  %v436_v41 = vrot.slane %v435_v21, 2 }
 0x16e   :  { %v467_v40 = vsub.f32 %v1289_v5, %v454_v35  ;;  %v477_v50 = vadd.f32 %v476_v37, %v472_v32  ;;  %v509_v22 = vpop.permute.xlu0 %508  ;;  %v342_v32 = vrot.slane %v341_v12, 2  ;;  %v520_v35 = vand.u32 2147483647, %v514_v19 }
 0x16f   :  { %v516_v36 = vsub.f32 %v1322_v49, %v509_v22  ;;  %v437_v25 = vadd.f32 %v436_v41, %v435_v21 }
 0x170   :  { %v473_v51 = vand.u32 2147483647, %v467_v40  ;;  %v343_v52 = vadd.f32 %v342_v32, %v341_v12 }
 0x171   :  { %1016 = vset.pattern.permute.xlu1 %v1066_v57  ;;  %v462_v20 = vpop.permute.xlu1 %461  ;;  %v438_v12 = vrot.slane %v437_v25, 1 }
 0x172   :  { %v478_v58 = vadd.f32 %v477_v50, %v473_v51  ;;  %v469_v59 = vsub.f32 %v1322_v49, %v462_v20  ;;  %696 = vperm.xlu1 %1016, %v1204_v44   ;;  %v540_v16 = vpop.permute.xlu0 %539  ;;  %v36_v50 = vmul.f32 %v1412_v39, %v1412_v39  ;;  %v522_v20 = vand.u32 2147483647, %v516_v36 }
 0x174   :  { %v475_v62 = vand.u32 2147483647, %v469_v59  ;;  %v479_v63 = vadd.f32 %v478_v58, %v474_v56  ;;  %v559_v58 = vsub.f32 %v1277_v61, %v540_v16  ;;  %v37_v39 = vmul.f32 0.25, %v36_v50 }
 0x176   :  { %v480_v57 = vadd.f32 %v479_v63, %v475_v62  ;;  %1017 = vset.pattern.permute.xlu1 %v1069_v48  ;;  %v493_v3 = vpop.permute.xlu1 %492  ;;  %v388_v48 = vadd.f32 %v387_v4, %v386_v60  ;;  %v1028_v28 = vpop.eup %1027  ;;  %v934_v63 = vlaneseq  ;;  %v565_v8 = vand.u32 2147483647, %v559_v58 }
 0x177   :  { %v512_v29 = vsub.f32 %v1277_v61, %v493_v3  ;;  %786 = vperm.xlu1 %1017, %v1207_v45   ;;  %v1030_v34 = vpop.eup %1029  ;;  %v33_v43 = vmul.f32 0.6931472, %v1028_v28  ;;  %v552_v3 = vpop.permute.xlu0 %551 }
 0x178   :  { %v481_v13 = vrot.slane %v480_v57, 4  ;;  %v389_v40 = vrot.slane %v388_v48, 2  ;;  %v40_v51 = vmul.f32 0.6931472, %v1030_v34 }
 0x179   :  { %v518_v11 = vand.u32 2147483647, %v512_v29  ;;  %v34_v62 = vsub.f32 0.0, %v33_v43 }
 0x17a   :  { %v497_v17 = vpop.permute.xlu1 %496  ;;  %v482_v33 = vadd.f32 %v481_v13, %v480_v57  ;;  %v390_v56 = vadd.f32 %v389_v40, %v388_v48  ;;  %v41_v2 = vsub.f32 0.0, %v40_v51  ;;  %v344_v57 = vrot.slane %v343_v52, 1 }
 0x17b   :  { %v513_v23 = vsub.f32 %v1292_v6, %v497_v17  ;;  %1018 = vset.pattern.permute.xlu1 %v1067_v10  ;;  %v523_v27 = vadd.f32 %v518_v11, %v517_v18  ;;  %v28_v10 = vmul.f32 %v1401_v46, %v1401_v46 }
 0x17c   :  { %743 = vperm.xlu1 %1018, %v1204_v44   ;;  %v483_v47 = vrot.slane %v482_v33, 2  ;;  %v391_v4 = vrot.slane %v390_v56, 1 }
 0x17d   :  { %v519_v9 = vand.u32 2147483647, %v513_v23  ;;  %v29_v59 = vmul.f32 0.75, %v28_v10  ;;  %v345_v23 = vadd.f32 %v344_v57, %v343_v52 }
 0x17e   :  { %v505_v31 = vpop.permute.xlu1 %504  ;;  %v484_v0 = vadd.f32 %v483_v47, %v482_v33  ;;  %v439_v33 = vadd.f32 %v438_v12, %v437_v25 }
 0x17f   :  { %v524_v55 = vadd.f32 %v523_v27, %v519_v9  ;;  %v515_v37 = vsub.f32 %v1301_v15, %v505_v31  ;;  %v35_v17 = vmul.f32 %v34_v62, %v29_v59  ;;  %v392_v27 = vadd.f32 %v391_v4, %v390_v56  ;;  %v583_v31 = vpop.permute.xlu0 %582 }
 0x180   :  { %1019 = vset.pattern.permute.xlu1 %v1068_v24  ;;  %v485_v18 = vrot.slane %v484_v0, 1  ;;  %v562_v9 = vsub.f32 %v1301_v15, %v552_v3  ;;  %v605_v58 = vsub.f32 %v1171_v30, %v583_v31 }
 0x181   :  { %v521_v26 = vand.u32 2147483647, %v515_v37  ;;  %v525_v38 = vadd.f32 %v524_v55, %v520_v35  ;;  %833 = vperm.xlu1 %1019, %v1207_v45   ;;  %v915_v37 = vsel %vm914_vm2, %v1363_v7, %v345_v23 }
 0x182   :  { %v486_v35 = vadd.f32 %v485_v18, %v484_v0  ;;  %v917_v10 = vsel %vm916_vm3, %v915_v37, %v392_v27  ;;  %v568_v41 = vand.u32 2147483647, %v562_v9  ;;  %v611_v62 = vand.u32 2147483647, %v605_v58 }
 0x183   :  { %v526_v53 = vadd.f32 %v525_v38, %v521_v26  ;;  %v536_v54 = vpop.permute.xlu1 %535  ;;  %v919_v38 = vsel %vm918_vm4, %v917_v10, %v439_v33  ;;  %v595_v7 = vpop.permute.xlu0 %594 }
 0x184   :  { %v558_v46 = vsub.f32 %v1171_v30, %v536_v54  ;;  %v921_v51 = vsel %vm920_vm5, %v919_v38, %v486_v35 }
 0x185   :  { %v527_v60 = vadd.f32 %v526_v53, %v522_v20  ;;  %1021 = vset.pattern.permute.xlu1 %v1070_v14  ;;  %v935_v14 = vshrl.u32 %v934_v63, 7  ;;  %v608_v63 = vsub.f32 %v1289_v5, %v595_v7 }
 0x186   :  { %v564_v1 = vand.u32 2147483647, %v558_v46  ;;  %880 = vperm.xlu1 %1021, %v1207_v45   ;;  %v42_v45 = vmul.f32 %v41_v2, %v37_v39 }
 0x187   :  { %v528_v42 = vrot.slane %v527_v60, 4  ;;  %v544_v29 = vpop.permute.xlu1 %543  ;;  %v936_v55 = vsub.s32 0, %v935_v14  ;;  %v603_v0 = vpop.permute.xlu0 %602 }
 0x188   :  { %v560_v11 = vsub.f32 %v1292_v6, %v544_v29  ;;  %v570_v19 = vadd.f32 %v565_v8, %v564_v1  ;;  %v43_v36 = vsub.f32 %v42_v45, %v35_v17  ;;  %v610_v29 = vsub.f32 %v1322_v49, %v603_v0 }
 0x189   :  { %v529_v13 = vadd.f32 %v528_v42, %v527_v60  ;;  %v614_v42 = vand.u32 2147483647, %v608_v63 }
 0x18a   :  { %v566_v22 = vand.u32 2147483647, %v560_v11  ;;  %1022 = vset.pattern.permute.xlu1 %v1068_v24  ;;  %v1458_v52 = vrot.slane %v43_v36, %v936_v55  ;;  %v616_v14 = vand.u32 2147483647, %v610_v29 }
 0x18b   :  { %v530_v48 = vrot.slane %v529_v13, 2  ;;  %837 = vperm.xlu1 %1022, %v1204_v44   ;;  %v548_v21 = vpop.permute.xlu1 %547  ;;  %v634_v11 = vpop.permute.xlu0 %633 }
 0x18c   :  { %v571_v28 = vadd.f32 %v570_v19, %v566_v22  ;;  %v561_v32 = vsub.f32 %v1289_v5, %v548_v21  ;;  %v653_v22 = vsub.f32 %v1277_v61, %v634_v11 }
 0x18d   :  { %v531_v34 = vadd.f32 %v530_v48, %v529_v13 }
 0x18e   :  { %v567_v24 = vand.u32 2147483647, %v561_v32 }
 0x18f   :  { %v532_v44 = vrot.slane %v531_v34, 1  ;;  %v556_v40 = vpop.permute.xlu1 %555  ;;  %v646_v33 = vpop.permute.xlu0 %645 }
 0x190   :  { %v572_v16 = vadd.f32 %v571_v28, %v567_v24  ;;  %v563_v26 = vsub.f32 %v1322_v49, %v556_v40  ;;  %v659_v28 = vand.u32 2147483647, %v653_v22  ;;  %v656_v37 = vsub.f32 %v1301_v15, %v646_v33 }
 0x191   :  { %v533_v43 = vadd.f32 %v532_v44, %v531_v34 }
 0x192   :  { %v569_v47 = vand.u32 2147483647, %v563_v26  ;;  %v573_v50 = vadd.f32 %v572_v16, %v568_v41 }
 0x193   :  { %v923_v20 = vsel %vm922_vm6, %v921_v51, %v533_v43  ;;  %v662_v43 = vand.u32 2147483647, %v656_v37 }
 0x194   :  { %v574_v53 = vadd.f32 %v573_v50, %v569_v47  ;;  %v587_v54 = vpop.permute.xlu1 %586  ;;  %v931_v56 = vmul.f32 0.01, %v923_v20 }
 0x195   :  { %v606_v46 = vsub.f32 %v1277_v61, %v587_v54 }
 0x196   :  { %v939_v59 = vadd.f32 %v1458_v52, %v931_v56  ;;  %v575_v39 = vrot.slane %v574_v53, 4 }
 0x197   :  { %v612_v25 = vand.u32 2147483647, %v606_v46 }
 0x198   :  { %v591_v60 = vpop.permute.xlu1 %590  ;;  %941 = vst [vmem:[#allocation2] sm:$0xff] %v939_v59  ;;  %v576_v12 = vadd.f32 %v575_v39, %v574_v53 }
 0x199   :  { %v607_v1 = vsub.f32 %v1292_v6, %v591_v60  ;;  %v617_v2 = vadd.f32 %v612_v25, %v611_v62 }
 0x19a   :  { %v577_v23 = vrot.slane %v576_v12, 2 }
 0x19b   :  { %v613_v57 = vand.u32 2147483647, %v607_v1 }
 0x19c   :  { %v599_v3 = vpop.permute.xlu1 %598  ;;  %v578_v31 = vadd.f32 %v577_v23, %v576_v12 }
 0x19d   :  { %v618_v4 = vadd.f32 %v617_v2, %v613_v57  ;;  %v609_v8 = vsub.f32 %v1301_v15, %v599_v3  ;;  %v677_v3 = vpop.permute.xlu0 %676 }
 0x19e   :  { %v579_v10 = vrot.slane %v578_v31, 1  ;;  %v699_v23 = vsub.f32 %v1171_v30, %v677_v3 }
 0x19f   :  { %v615_v13 = vand.u32 2147483647, %v609_v8  ;;  %v619_v17 = vadd.f32 %v618_v4, %v614_v42 }
 0x1a0   :  { %v580_v51 = vadd.f32 %v579_v10, %v578_v31 }
 0x1a1   :  { %v620_v18 = vadd.f32 %v619_v17, %v615_v13  ;;  %v630_v19 = vpop.permute.xlu1 %629  ;;  %v689_v29 = vpop.permute.xlu0 %688 }
 0x1a2   :  { %v652_v45 = vsub.f32 %v1171_v30, %v630_v19  ;;  %v702_v31 = vsub.f32 %v1289_v5, %v689_v29 }
 0x1a3   :  { %v621_v48 = vadd.f32 %v620_v18, %v616_v14 }
 0x1a4   :  { %v658_v21 = vand.u32 2147483647, %v652_v45 }
 0x1a5   :  { %v622_v27 = vrot.slane %v621_v48, 4  ;;  %v638_v9 = vpop.permute.xlu1 %637  ;;  %v724_v8 = vpop.permute.xlu0 %723 }
 0x1a6   :  { %v654_v32 = vsub.f32 %v1292_v6, %v638_v9  ;;  %v664_v35 = vadd.f32 %v659_v28, %v658_v21  ;;  %v705_v28 = vand.u32 2147483647, %v699_v23 }
 0x1a7   :  { %v623_v34 = vadd.f32 %v622_v27, %v621_v48 }
 0x1a8   :  { %v660_v24 = vand.u32 2147483647, %v654_v32 }
 0x1a9   :  { %v624_v36 = vrot.slane %v623_v34, 2  ;;  %v642_v55 = vpop.permute.xlu1 %641  ;;  %v1482_v13 = vpop.permute.xlu0 %821 }
 0x1aa   :  { %v665_v44 = vadd.f32 %v664_v35, %v660_v24  ;;  %v655_v40 = vsub.f32 %v1289_v5, %v642_v55 }
 0x1ab   :  { %v625_v41 = vadd.f32 %v624_v36, %v623_v34 }
 0x1ac   :  { %v661_v16 = vand.u32 2147483647, %v655_v40 }
 0x1ad   :  { %v626_v26 = vrot.slane %v625_v41, 1  ;;  %v650_v38 = vpop.permute.xlu1 %649  ;;  %v1484_v14 = vpop.permute.xlu0 %829 }
 0x1ae   :  { %v666_v47 = vadd.f32 %v665_v44, %v661_v16  ;;  %v657_v50 = vsub.f32 %v1322_v49, %v650_v38 }
 0x1af   :  { %v627_v7 = vadd.f32 %v626_v26, %v625_v41  ;;  %v746_v41 = vsub.f32 %v1171_v30, %v724_v8  ;;  %v708_v26 = vand.u32 2147483647, %v702_v31 }
 0x1b0   :  { %v663_v20 = vand.u32 2147483647, %v657_v50  ;;  %v667_v53 = vadd.f32 %v666_v47, %v662_v43 }
 0x1b1   :  { %v924_v54 = vsel %vm910_vm0, %v580_v51, %v627_v7  ;;  %v775_v19 = vpop.permute.xlu0 %774 }
 0x1b2   :  { %v668_v56 = vadd.f32 %v667_v53, %v663_v20  ;;  %v681_v58 = vpop.permute.xlu1 %680  ;;  %v794_v34 = vsub.f32 %v1277_v61, %v775_v19 }
 0x1b3   :  { %v700_v22 = vsub.f32 %v1277_v61, %v681_v58 }
 0x1b4   :  { %v669_v46 = vrot.slane %v668_v56, 4  ;;  %v800_v38 = vand.u32 2147483647, %v794_v34  ;;  %v841_v34 = vsub.f32 %v1277_v61, %v1482_v13  ;;  %v843_v13 = vsub.f32 %v1289_v5, %v1484_v14 }
 0x1b5   :  { %v783_v21 = vpop.permute.xlu0 %782  ;;  %v706_v27 = vand.u32 2147483647, %v700_v22 }
 0x1b6   :  { %v670_v59 = vadd.f32 %v669_v46, %v668_v56  ;;  %v685_v25 = vpop.permute.xlu1 %684  ;;  %v796_v7 = vsub.f32 %v1289_v5, %v783_v21  ;;  %v752_v56 = vand.u32 2147483647, %v746_v41 }
 0x1b7   :  { %v701_v48 = vsub.f32 %v1292_v6, %v685_v25  ;;  %v711_v35 = vadd.f32 %v706_v27, %v705_v28 }
 0x1b8   :  { %v671_v60 = vrot.slane %v670_v59, 2 }
 0x1b9   :  { %v707_v32 = vand.u32 2147483647, %v701_v48  ;;  %v791_v55 = vpop.permute.xlu0 %790 }
 0x1ba   :  { %v672_v62 = vadd.f32 %v671_v60, %v670_v59  ;;  %v693_v63 = vpop.permute.xlu1 %692 }
 0x1bb   :  { %v712_v37 = vadd.f32 %v711_v35, %v707_v32  ;;  %v703_v44 = vsub.f32 %v1301_v15, %v693_v63 }
 0x1bc   :  { %v673_v0 = vrot.slane %v672_v62, 1 }
 0x1bd   :  { %v709_v20 = vand.u32 2147483647, %v703_v44  ;;  %v713_v53 = vadd.f32 %v712_v37, %v708_v26  ;;  %v869_v25 = vpop.permute.xlu0 %868 }
 0x1be   :  { %v674_v1 = vadd.f32 %v673_v0, %v672_v62 }
 0x1bf   :  { %v728_v39 = vpop.permute.xlu1 %727 }
 0x1c0   :  { %v1476_v2 = vsel %vm912_vm1, %v924_v54, %v674_v1  ;;  %v747_v36 = vsub.f32 %v1277_v61, %v728_v39  ;;  %v802_v39 = vand.u32 2147483647, %v796_v7 }
 0x1c2   :  { %v753_v47 = vand.u32 2147483647, %v747_v36 }
 0x1c4   :  { %v771_v57 = vpop.permute.xlu1 %770  ;;  %v758_v63 = vadd.f32 %v753_v47, %v752_v56 }
 0x1c5   :  { %v793_v33 = vsub.f32 %v1171_v30, %v771_v57  ;;  %v714_v57 = vadd.f32 %v713_v53, %v709_v20 }
 0x1c7   :  { %v799_v40 = vand.u32 2147483647, %v793_v33 }
 0x1c9   :  { %v732_v42 = vpop.permute.xlu1 %731  ;;  %v805_v54 = vadd.f32 %v800_v38, %v799_v40 }
 0x1ca   :  { %v748_v16 = vsub.f32 %v1292_v6, %v732_v42 }
 0x1cc   :  { %v754_v58 = vand.u32 2147483647, %v748_v16  ;;  %v847_v16 = vand.u32 2147483647, %v841_v34 }
 0x1ce   :  { %v1478_v4 = vpop.permute.xlu1 %817  ;;  %v759_v3 = vadd.f32 %v758_v63, %v754_v58 }
 0x1cf   :  { %v840_v28 = vsub.f32 %v1171_v30, %v1478_v4 }
 0x1d1   :  { %v846_v40 = vand.u32 2147483647, %v840_v28 }
 0x1d3   :  { %v779_v11 = vpop.permute.xlu1 %778 }
 0x1d4   :  { %v795_v24 = vsub.f32 %v1292_v6, %v779_v11  ;;  %v798_v11 = vsub.f32 %v1322_v49, %v791_v55 }
 0x1d6   :  { %v801_v43 = vand.u32 2147483647, %v795_v24  ;;  %v804_v35 = vand.u32 2147483647, %v798_v11 }
 0x1d8   :  { %v1480_v12 = vpop.permute.xlu1 %864  ;;  %v806_v60 = vadd.f32 %v805_v54, %v801_v43 }
 0x1d9   :  { %v887_v42 = vsub.f32 %v1171_v30, %v1480_v12 }
 0x1da   :  { %v807_v19 = vadd.f32 %v806_v60, %v802_v39 }
 0x1db   :  { %v893_v12 = vand.u32 2147483647, %v887_v42 }
 0x1dd   :  { %v736_v17 = vpop.permute.xlu1 %735 }
 0x1de   :  { %v749_v50 = vsub.f32 %v1289_v5, %v736_v17  ;;  %v888_v17 = vsub.f32 %v1277_v61, %v869_v25 }
 0x1e0   :  { %v755_v0 = vand.u32 2147483647, %v749_v50  ;;  %v894_v36 = vand.u32 2147483647, %v888_v17 }
 0x1e2   :  { %v1486_v18 = vpop.permute.xlu1 %825  ;;  %v760_v23 = vadd.f32 %v759_v3, %v755_v0  ;;  %v899_v30 = vadd.f32 %v894_v36, %v893_v12 }
 0x1e3   :  { %v842_v24 = vsub.f32 %v1292_v6, %v1486_v18 }
 0x1e5   :  { %v848_v38 = vand.u32 2147483647, %v842_v24 }
 0x1e7   :  { %v1489_v45 = vpop.permute.xlu1 %872 }
 0x1e8   :  { %v889_v48 = vsub.f32 %v1292_v6, %v1489_v45  ;;  %v852_v6 = vadd.f32 %v847_v16, %v846_v40 }
 0x1ea   :  { %v895_v45 = vand.u32 2147483647, %v889_v48  ;;  %v853_v54 = vadd.f32 %v852_v6, %v848_v38 }
 0x1ec   :  { %v740_v9 = vpop.permute.xlu1 %739  ;;  %v900_v43 = vadd.f32 %v899_v30, %v895_v45 }
 0x1ed   :  { %v750_v46 = vsub.f32 %v1301_v15, %v740_v9  ;;  %v877_v9 = vpop.permute.xlu0 %876 }
 0x1ef   :  { %v756_v29 = vand.u32 2147483647, %v750_v46 }
 0x1f1   :  { %v697_v10 = vpop.permute.xlu1 %696  ;;  %v761_v32 = vadd.f32 %v760_v23, %v756_v29  ;;  %v885_v26 = vpop.permute.xlu0 %884 }
 0x1f2   :  { %v704_v51 = vsub.f32 %v1322_v49, %v697_v10  ;;  %v890_v10 = vsub.f32 %v1289_v5, %v877_v9  ;;  %v892_v7 = vsub.f32 %v1322_v49, %v885_v26 }
 0x1f4   :  { %v710_v1 = vand.u32 2147483647, %v704_v51  ;;  %v896_v51 = vand.u32 2147483647, %v890_v10 }
 0x1f6   :  { %v787_v59 = vpop.permute.xlu1 %786  ;;  %v715_v21 = vadd.f32 %v714_v57, %v710_v1  ;;  %v901_v46 = vadd.f32 %v900_v43, %v896_v51 }
 0x1f7   :  { %v797_v62 = vsub.f32 %v1301_v15, %v787_v59  ;;  %v849_v59 = vand.u32 2147483647, %v843_v13 }
 0x1f8   :  { %v716_v55 = vrot.slane %v715_v21, 4 }
 0x1f9   :  { %v803_v8 = vand.u32 2147483647, %v797_v62  ;;  %v898_v62 = vand.u32 2147483647, %v892_v7  ;;  %v854_v0 = vadd.f32 %v853_v54, %v849_v59 }
 0x1fa   :  { %v717_v61 = vadd.f32 %v716_v55, %v715_v21 }
 0x1fb   :  { %v744_v22 = vpop.permute.xlu1 %743  ;;  %v808_v33 = vadd.f32 %v807_v19, %v803_v8 }
 0x1fc   :  { %v751_v27 = vsub.f32 %v1322_v49, %v744_v22  ;;  %v718_v56 = vrot.slane %v717_v61, 2 }
 0x1fd   :  { %v809_v4 = vadd.f32 %v808_v33, %v804_v35 }
 0x1fe   :  { %v757_v31 = vand.u32 2147483647, %v751_v27  ;;  %v719_v39 = vadd.f32 %v718_v56, %v717_v61 }
 0x1ff   :  { %v810_v20 = vrot.slane %v809_v4, 4 }
 0x200   :  { %v762_v37 = vadd.f32 %v761_v32, %v757_v31  ;;  %v834_v44 = vpop.permute.xlu1 %833  ;;  %v720_v17 = vrot.slane %v719_v39, 1 }
 0x201   :  { %v844_v47 = vsub.f32 %v1301_v15, %v834_v44  ;;  %v811_v5 = vadd.f32 %v810_v20, %v809_v4 }
 0x202   :  { %v763_v41 = vrot.slane %v762_v37, 4  ;;  %v721_v9 = vadd.f32 %v720_v17, %v719_v39 }
 0x203   :  { %v850_v60 = vand.u32 2147483647, %v844_v47 }
 0x204   :  { %v764_v18 = vadd.f32 %v763_v41, %v762_v37  ;;  %v926_v31 = vsel %vm914_vm2, %v1476_v2, %v721_v9 }
 0x205   :  { %v881_v50 = vpop.permute.xlu1 %880  ;;  %v855_v42 = vadd.f32 %v854_v0, %v850_v60 }
 0x206   :  { %v891_v53 = vsub.f32 %v1301_v15, %v881_v50  ;;  %v765_v25 = vrot.slane %v764_v18, 2  ;;  %v812_v15 = vrot.slane %v811_v5, 2 }
 0x208   :  { %v897_v58 = vand.u32 2147483647, %v891_v53  ;;  %v766_v3 = vadd.f32 %v765_v25, %v764_v18  ;;  %v813_v48 = vadd.f32 %v812_v15, %v811_v5 }
 0x20a   :  { %v902_v14 = vadd.f32 %v901_v46, %v897_v58  ;;  %v838_v63 = vpop.permute.xlu1 %837  ;;  %v767_v22 = vrot.slane %v766_v3, 1 }
 0x20b   :  { %v845_v1 = vsub.f32 %v1322_v49, %v838_v63  ;;  %v814_v49 = vrot.slane %v813_v48, 1 }
 0x20c   :  { %v903_v57 = vadd.f32 %v902_v14, %v898_v62  ;;  %v768_v12 = vadd.f32 %v767_v22, %v766_v3 }
 0x20d   :  { %v851_v29 = vand.u32 2147483647, %v845_v1  ;;  %v815_v36 = vadd.f32 %v814_v49, %v813_v48 }
 0x20e   :  { %v904_v8 = vrot.slane %v903_v57, 4  ;;  %v927_v35 = vsel %vm916_vm3, %v926_v31, %v768_v12 }
 0x20f   :  { %v856_v11 = vadd.f32 %v855_v42, %v851_v29  ;;  %v928_v37 = vsel %vm918_vm4, %v927_v35, %v815_v36 }
 0x210   :  { %v905_v19 = vadd.f32 %v904_v8, %v903_v57 }
 0x211   :  { %v857_v23 = vrot.slane %v856_v11, 4 }
 0x212   :  { %v906_v21 = vrot.slane %v905_v19, 2 }
 0x213   :  { %v858_v27 = vadd.f32 %v857_v23, %v856_v11 }
 0x214   :  { %v907_v28 = vadd.f32 %v906_v21, %v905_v19 }
 0x215   :  { %v859_v32 = vrot.slane %v858_v27, 2 }
 0x216   :  { %v908_v34 = vrot.slane %v907_v28, 1 }
 0x217   :  { %v860_v33 = vadd.f32 %v859_v32, %v858_v27 }
 0x218   :  { %v909_v55 = vadd.f32 %v908_v34, %v907_v28 }
 0x219   :  { %v861_v24 = vrot.slane %v860_v33, 1 }
 0x21b   :  { %v862_v45 = vadd.f32 %v861_v24, %v860_v33 }
 0x21d   :  { %v929_v44 = vsel %vm920_vm5, %v928_v37, %v862_v45 }
 0x21e   :  { %v930_v40 = vsel %vm922_vm6, %v929_v44, %v909_v55 }
 0x21f   :  { %v932_v10 = vmul.f32 0.01, %v930_v40 }
 0x221   :  { %v940_v30 = vadd.f32 %v1458_v52, %v932_v10 }
 0x223   :  { %942 = vst [vmem:[#allocation2 + $0x8] sm:$0xff] %v940_v30 }
 0x224   :  { %1042 = shalt.err (!%p1039_p4)
}
 0x225   :  { %s1043_s17 = scalar_lea.hbm %s1550_s5, 256 }
 0x226   :  { %p1044_p5 = scmp.ne.s32.totalorder %s1550_s5, %s1043_s17  ;;  %p1047_p6 = scmp.lt.u32.totalorder %s1043_s17, %s1550_s5 }
 0x228   :  { %p1049_p7 = pnand %p1047_p6, %p1044_p5 }
 0x22a   :  { %1052 = shalt.err (!%p1049_p7)
}
 0x22b   :  { %s1072_s4 = smov 128   ;;  %s1073_s22 = smov 8  }
 0x22c   :  { %954 = dma.vmem_to_hbm [thread:$0]  %s949_s13, 256, %s1550_s5, [#allocation3], %s1072_s4, %s1072_s4, %s1073_s22  }
 0x22d   :  { %1053 = dma.done.wait [#allocation3], 256  }
 0x22e   :  { %1054 = vsyncadd [#allocation3], 4294967040 }
 0x22f   :  { %958 = vsyncpa [#allocation3], 1 }

</bundles_post_ra>
